<compile_context>
chip_gen: v5e
topology: v5e:2x2
jax: 0.10.0
libtpu: 0.0.40
codegen_flags: <defaults>
</compile_context>

<pallas_src>
import math

import jax
import jax.numpy as jnp
from jax import lax
from jax.experimental import pallas as pl
from jax.experimental.pallas import tpu as pltpu

_OPERAND_DTYPE = jnp.bfloat16     # MXU operand dtype; accumulation is always f32.


def _round_up(x, m):
    return -(-x // m) * m


def _make_down_kernel(nb, cin, f1, B, h1, w1, negval, fuse_tail):
    """Fused kernel: stride-2 conv (+LeakyReLU) [+ stride-1 conv], K-stacked matmuls.

    Flat layouts (row pitch B >= w1 + 2), per packed image j of nb:
      input  : x_ref[j]  (4, cin, LP)  parity-split padded planar slabs
      interm : act       (f1, L1)      conv1 output (pitch-garbage cols masked to 0)
      scratch: s2_ref    (f1, nb*S2)   zero-padded planar conv2 input, pitch B
      output : o_ref[j]  (c_pad, L2)   conv2 output at pitch B (sliced outside)
    """
    L1 = (h1 - 1) * B + w1
    L2 = h1 * B
    S2 = (h1 + 2) * B + 2

    def im2col(read_tap):
        # One (9*n_in, nb*L) operand: 9 shifted views stacked along the contraction
        # dim, nb images concatenated along lanes (fills lanes of a single matmul).
        cols = []
        for j in range(nb):
            taps = [read_tap(j, kh, kw) for kh in range(3) for kw in range(3)]
            cols.append(jnp.concatenate(taps, axis=0))
        return jnp.concatenate(cols, axis=1) if nb > 1 else cols[0]

    def conv1(x_ref, w1_ref):
        def tap(j, kh, kw):
            q = (kh % 2) * 2 + (kw % 2)              # parity slab
            s = (kh // 2) * B + (kw // 2)            # flat offset inside the slab
            return x_ref[j, q, :, s:s + L1]          # (cin, L1) bf16, straight off the ref
        acc = jnp.dot(w1_ref[...], im2col(tap),      # single MXU matmul, K = 9*cin
                      preferred_element_type=jnp.float32)
        return jnp.where(acc >= 0.0, acc, negval * acc)   # LeakyReLU in f32

    if fuse_tail:

        def kernel(x_ref, mask_ref, w1_ref, w2_ref, o_ref, s2_ref):
            act = conv1(x_ref, w1_ref) * mask_ref[...]     # zero pitch-garbage cols
            act_lo = act.astype(s2_ref.dtype)

            # Stage conv2's zero-padded planar input.  Only the padding strips the
            # interior copy never touches are zeroed (~2*B cols/img, not the whole
            # scratch); done every step on purpose -- see header comment.
            for j in range(nb):
                base = j * S2
                s2_ref[:, base:base + B + 1] = jnp.zeros((f1, B + 1), s2_ref.dtype)
                s2_ref[:, base + B + 1 + L1:base + S2] = jnp.zeros(
                    (f1, S2 - (B + 1) - L1), s2_ref.dtype)
                # Valid pixels land on the interior; masked garbage cols land
                # exactly on conv2 padding positions (mapping is tied to pitch B).
                s2_ref[:, base + B + 1:base + B + 1 + L1] = \
                    act_lo[:, j * L1:(j + 1) * L1]

            def tap2(j, kh, kw):
                s = j * S2 + kh * B + kw
                return s2_ref[:, s:s + L2]                  # (f1, L2) bf16
            acc2 = jnp.dot(w2_ref[...], im2col(tap2),       # single matmul, K = 9*f1
                           preferred_element_type=jnp.float32)
            for j in range(nb):
                o_ref[j] = acc2[:, j * L2:(j + 1) * L2].astype(o_ref.dtype)

        return kernel

    def kernel(x_ref, w1_ref, o_ref):
        act = conv1(x_ref, w1_ref)      # garbage cols are sliced off in the wrapper
        for j in range(nb):
            o_ref[j] = act[:, j * L1:(j + 1) * L1].astype(o_ref.dtype)

    return kernel


def down_step_pallas(x_nchw, w_s2_hwio, w_tail_hwio, negval):
    """One fused step: stride-2 conv + LeakyReLU [+ final stride-1 conv]. NCHW in/out."""
    n, cin, h, w = x_nchw.shape
    if h % 2 or w % 2:
        raise ValueError("even spatial dims required")   # TODO(synk): odd H/W support
    assert w_s2_hwio.shape[:3] == (3, 3, cin)

    h1, w1 = h // 2, w // 2
    # Flat row pitch: natural w1+2 for small widths; lane-aligned for large widths so
    # tap offsets are aligned and the output writeback is unmasked lane-dense vst.
    B = w1 + 2
    if B >= 128:
        B = _round_up(B, 128)
    LP = (h1 + 1) * B               # flat size of one parity slab
    L1 = (h1 - 1) * B + w1          # conv1 flat output length
    L2 = h1 * B                     # conv2 flat output length
    S2 = (h1 + 2) * B + 2           # conv2 padded flat input length (per image)

    f1 = w_s2_hwio.shape[-1]
    fuse_tail = w_tail_hwio is not None
    c_last = w_tail_hwio.shape[-1] if fuse_tail else f1
    c_pad = _round_up(c_last, 8)    # full-sublane f32 output stores
    out_len = L2 if fuse_tail else L1
    out_dtype = x_nchw.dtype

    # Images packed per grid step (amortize per-step overhead, fill matmul lanes).
    per_img = (4 * cin * LP * 2 + c_pad * out_len * 4
               + 9 * cin * L1 * 2 + (f1 + c_pad) * max(L1, L2) * 4
               + (f1 * S2 * 2 + 9 * f1 * L2 * 2 if fuse_tail else 0))
    nb = 1
    for cand in range(1, n + 1):
        if n % cand == 0 and cand * per_img <= (4 << 20):
            nb = cand

    # ---- wrapper prep: one pad + transpose building the 2x2 parity slabs ----
    # xp[n, ph*2+pw, c, a*B + b] = xpad[n, c, 2a+ph, 2b+pw]
    xp = jnp.pad(x_nchw, ((0, 0), (0, 0), (1, 1), (1, 2 * B - w - 1)))
    xp = xp.reshape(n, cin, h1 + 1, 2, B, 2)
    xp = jnp.transpose(xp, (0, 3, 5, 1, 2, 4)).reshape(n, 4, cin, LP)
    xp = xp.astype(_OPERAND_DTYPE)

    # K-stacked weights: (n_out, 9*n_in), column order (kh, kw, c_in) matches im2col.
    w1s = jnp.transpose(w_s2_hwio, (3, 0, 1, 2)).reshape(f1, 9 * cin)
    if not fuse_tail:
        w1s = jnp.pad(w1s, ((0, c_pad - f1), (0, 0)))
    w1s = w1s.astype(_OPERAND_DTYPE)

    kernel = _make_down_kernel(nb, cin, f1, B, h1, w1, float(negval), fuse_tail)

    in_specs = [pl.BlockSpec((nb, 4, cin, LP), lambda g: (g, 0, 0, 0))]
    args = [xp]
    if fuse_tail:
        # Column-validity mask of the pitch-B flat layout, tiled over packed images.
        mask = ((jnp.arange(L1, dtype=jnp.int32) % B) < w1).astype(jnp.float32)
        mask = jnp.tile(mask[None, :], (1, nb))
        in_specs.append(pl.BlockSpec((1, nb * L1), lambda g: (0, 0)))
        args.append(mask)
    in_specs.append(pl.BlockSpec(w1s.shape, lambda g: (0, 0)))
    args.append(w1s)

    scratch_shapes = []
    if fuse_tail:
        w2s = jnp.transpose(w_tail_hwio, (3, 0, 1, 2)).reshape(c_last, 9 * f1)
        w2s = jnp.pad(w2s, ((0, c_pad - c_last), (0, 0))).astype(_OPERAND_DTYPE)
        in_specs.append(pl.BlockSpec(w2s.shape, lambda g: (0, 0)))
        args.append(w2s)
        scratch_shapes.append(pltpu.VMEM((f1, nb * S2), _OPERAND_DTYPE))

    # Footprint-derived scoped-VMEM limit instead of a hard-coded constant.
    weights_b = sum(int(a.size) * a.dtype.itemsize for a in args[1:])
    footprint = 2 * nb * (4 * cin * LP * 2 + c_pad * out_len * 4) \
        + nb * per_img + weights_b
    try:
        phys = pltpu.get_tpu_info().vmem_capacity_bytes
    except Exception:
        phys = 64 << 20                      # conservative (v7x per-TC) fallback
    vmem_limit = int(min(int(phys * 0.75), max(32 << 20, 2 * footprint)))

    flops = 2 * n * 9 * (cin * f1 * L1 + (f1 * c_pad * L2 if fuse_tail else 0))
    bytes_accessed = sum(int(a.size) * a.dtype.itemsize for a in args) \
        + n * c_pad * out_len * jnp.dtype(out_dtype).itemsize

    y_flat = pl.pallas_call(
        kernel,
        out_shape=jax.ShapeDtypeStruct((n, c_pad, out_len), out_dtype),
        grid=(n // nb,),
        in_specs=in_specs,
        out_specs=pl.BlockSpec((nb, c_pad, out_len), lambda g: (g, 0, 0)),
        scratch_shapes=scratch_shapes,
        compiler_params=pltpu.CompilerParams(
            dimension_semantics=("parallel",),
            vmem_limit_bytes=vmem_limit,
        ),
        cost_estimate=pl.CostEstimate(
            flops=int(flops), transcendentals=0,
            bytes_accessed=int(bytes_accessed)),
    )(*args)

    # ---- wrapper post: free reshape + slice back to NCHW ----
    if not fuse_tail:
        y_flat = jnp.pad(y_flat, ((0, 0), (0, 0), (0, h1 * B - L1)))
    y = y_flat.reshape(n, c_pad, h1, B)[:, :c_last, :, :w1]
    return y


class DownBlockPallas:
    """Pallas implementation of DownBlock.forward (NCHW in / NCHW out)."""

    def __init__(self, key, *, scale, n_feats, in_channels, out_channels, negval):
        self.negval = float(negval)
        n_strided = max(int(math.log2(scale)), 1)
        keys = jax.random.split(key, n_strided + 1)
        self.strided_weights = []          # HWIO weights of the stride-2 convs
        c_in = in_channels
        for li in range(n_strided):
            w = 0.05 * jax.random.normal(keys[li], (3, 3, c_in, n_feats),
                                         dtype=jnp.float32)
            self.strided_weights.append(w)
            c_in = n_feats
        self.final_weight = 0.05 * jax.random.normal(
            keys[-1], (3, 3, n_feats, out_channels), dtype=jnp.float32)

    def __call__(self, x_nchw):
        y = x_nchw
        last = len(self.strided_weights) - 1
        for i, w in enumerate(self.strided_weights):
            tail = self.final_weight if i == last else None
            y = down_step_pallas(y, w, tail, self.negval)
        return y

    def reference(self, x_nchw):
        """Pure-JAX reference (f32, HIGHEST) with the module's exact semantics."""
        y = x_nchw
        for w in self.strided_weights:
            y = lax.conv_general_dilated(
                y, w, (2, 2), ((1, 1), (1, 1)),
                dimension_numbers=("NCHW", "HWIO", "NCHW"),
                precision=lax.Precision.HIGHEST)
            y = jnp.where(y >= 0, y, self.negval * y)
        return lax.conv_general_dilated(
            y, self.final_weight, (1, 1), ((1, 1), (1, 1)),
            dimension_numbers=("NCHW", "HWIO", "NCHW"),
            precision=lax.Precision.HIGHEST)

    def reference_bf16(self, x_nchw):
        """Reference with the kernel's dtype flow (bf16 operands, f32 accumulation)."""
        y = x_nchw.astype(_OPERAND_DTYPE)
        for w in self.strided_weights:
            y = lax.conv_general_dilated(
                y, w.astype(_OPERAND_DTYPE), (2, 2), ((1, 1), (1, 1)),
                dimension_numbers=("NCHW", "HWIO", "NCHW"),
                preferred_element_type=jnp.float32)
            y = jnp.where(y >= 0, y, self.negval * y).astype(_OPERAND_DTYPE)
        return lax.conv_general_dilated(
            y, self.final_weight.astype(_OPERAND_DTYPE), (1, 1), ((1, 1), (1, 1)),
            dimension_numbers=("NCHW", "HWIO", "NCHW"),
            preferred_element_type=jnp.float32)


if __name__ == "__main__":
    key = jax.random.PRNGKey(0)
    k_x, k_b2, k_b4 = jax.random.split(key, 3)

    n_feats, n_colors, negval = 8, 3, 0.2
    N, H, W = 2, 16, 16
    x = jax.random.normal(k_x, (N, n_colors, H, W), dtype=jnp.float32)

    # scale=2 exercises the fused (strided + tail) kernel; scale=4 also exercises
    # the standalone strided kernel of the chained path.
    for scale, k_w in ((2, k_b2), (4, k_b4)):
        block = DownBlockPallas(k_w, scale=scale, n_feats=n_feats,
                                in_channels=n_colors, out_channels=n_colors,
                                negval=negval)
        y = jax.block_until_ready(block(x))
        assert y.shape == (N, n_colors, H // scale, W // scale), (scale, y.shape)

        y_ref = jax.block_until_ready(block.reference(x))
        y_ref16 = jax.block_until_ready(block.reference_bf16(x))
        # Tight check: identical bf16 operand rounding + f32 accumulation.
        tight = float(jnp.max(jnp.abs(y - y_ref16)))
        # Loose check: against the exact f32 module semantics (bf16 error budget).
        loose = float(jnp.max(jnp.abs(y - y_ref)))
        assert tight < 1e-3, (scale, tight)
        assert jnp.allclose(y, y_ref, atol=1e-2, rtol=1e-2), (scale, loose)

    print("KERNEL_OK")
</pallas_src>

<mosaic_0001>
module attributes {stable_mosaic.version = 11 : i64} {
  func.func @kernel(%arg0: i32, %arg1: memref<2x4x3x90xbf16, #tpu.memory_space<vmem>>, %arg2: memref<1x156xf32, #tpu.memory_space<vmem>>, %arg3: memref<8x27xbf16, #tpu.memory_space<vmem>>, %arg4: memref<8x72xbf16, #tpu.memory_space<vmem>>, %arg5: memref<2x8x80xf32, #tpu.memory_space<vmem>>, %arg6: memref<8x204xbf16, #tpu.memory_space<vmem>>) attributes {dimension_semantics = [#tpu.dimension_semantics<parallel>], iteration_bounds = array<i64: 1>, scalar_prefetch = 0 : i64, scratch_operands = 1 : i64, tpu.core_type = #tpu.core_type<tc>, window_params = [{transform_indices = @transform_0, window_bounds = array<i64: 2, 4, 3, 90>}, {pipeline_mode = #tpu.pipeline_mode<synchronous>, transform_indices = @transform_1, window_bounds = array<i64: 1, 156>}, {pipeline_mode = #tpu.pipeline_mode<synchronous>, transform_indices = @transform_2, window_bounds = array<i64: 8, 27>}, {pipeline_mode = #tpu.pipeline_mode<synchronous>, transform_indices = @transform_3, window_bounds = array<i64: 8, 72>}, {transform_indices = @transform_4, window_bounds = array<i64: 2, 8, 80>}]} {
    %c0 = arith.constant 0 : index
    %c0_0 = arith.constant 0 : index
    %0 = vector.load %arg3[%c0, %c0_0] : memref<8x27xbf16, #tpu.memory_space<vmem>>, vector<8x27xbf16>
    %c0_1 = arith.constant 0 : index
    %c0_2 = arith.constant 0 : index
    %c0_3 = arith.constant 0 : index
    %c0_4 = arith.constant 0 : index
    %1 = vector.load %arg1[%c0_1, %c0_2, %c0_3, %c0_4] : memref<2x4x3x90xbf16, #tpu.memory_space<vmem>>, vector<1x1x3x78xbf16>
    %2 = vector.shape_cast %1 : vector<1x1x3x78xbf16> to vector<3x78xbf16>
    %c0_5 = arith.constant 0 : index
    %c1 = arith.constant 1 : index
    %c0_6 = arith.constant 0 : index
    %c0_7 = arith.constant 0 : index
    %3 = vector.load %arg1[%c0_5, %c1, %c0_6, %c0_7] : memref<2x4x3x90xbf16, #tpu.memory_space<vmem>>, vector<1x1x3x78xbf16>
    %4 = vector.shape_cast %3 : vector<1x1x3x78xbf16> to vector<3x78xbf16>
    %c0_8 = arith.constant 0 : index
    %c0_9 = arith.constant 0 : index
    %c0_10 = arith.constant 0 : index
    %c1_11 = arith.constant 1 : index
    %5 = vector.load %arg1[%c0_8, %c0_9, %c0_10, %c1_11] : memref<2x4x3x90xbf16, #tpu.memory_space<vmem>>, vector<1x1x3x78xbf16>
    %6 = vector.shape_cast %5 : vector<1x1x3x78xbf16> to vector<3x78xbf16>
    %c0_12 = arith.constant 0 : index
    %c2 = arith.constant 2 : index
    %c0_13 = arith.constant 0 : index
    %c0_14 = arith.constant 0 : index
    %7 = vector.load %arg1[%c0_12, %c2, %c0_13, %c0_14] : memref<2x4x3x90xbf16, #tpu.memory_space<vmem>>, vector<1x1x3x78xbf16>
    %8 = vector.shape_cast %7 : vector<1x1x3x78xbf16> to vector<3x78xbf16>
    %c0_15 = arith.constant 0 : index
    %c3 = arith.constant 3 : index
    %c0_16 = arith.constant 0 : index
    %c0_17 = arith.constant 0 : index
    %9 = vector.load %arg1[%c0_15, %c3, %c0_16, %c0_17] : memref<2x4x3x90xbf16, #tpu.memory_space<vmem>>, vector<1x1x3x78xbf16>
    %10 = vector.shape_cast %9 : vector<1x1x3x78xbf16> to vector<3x78xbf16>
    %c0_18 = arith.constant 0 : index
    %c2_19 = arith.constant 2 : index
    %c0_20 = arith.constant 0 : index
    %c1_21 = arith.constant 1 : index
    %11 = vector.load %arg1[%c0_18, %c2_19, %c0_20, %c1_21] : memref<2x4x3x90xbf16, #tpu.memory_space<vmem>>, vector<1x1x3x78xbf16>
    %12 = vector.shape_cast %11 : vector<1x1x3x78xbf16> to vector<3x78xbf16>
    %c0_22 = arith.constant 0 : index
    %c0_23 = arith.constant 0 : index
    %c0_24 = arith.constant 0 : index
    %c10 = arith.constant 10 : index
    %13 = vector.load %arg1[%c0_22, %c0_23, %c0_24, %c10] : memref<2x4x3x90xbf16, #tpu.memory_space<vmem>>, vector<1x1x3x78xbf16>
    %14 = vector.shape_cast %13 : vector<1x1x3x78xbf16> to vector<3x78xbf16>
    %c0_25 = arith.constant 0 : index
    %c1_26 = arith.constant 1 : index
    %c0_27 = arith.constant 0 : index
    %c10_28 = arith.constant 10 : index
    %15 = vector.load %arg1[%c0_25, %c1_26, %c0_27, %c10_28] : memref<2x4x3x90xbf16, #tpu.memory_space<vmem>>, vector<1x1x3x78xbf16>
    %16 = vector.shape_cast %15 : vector<1x1x3x78xbf16> to vector<3x78xbf16>
    %c0_29 = arith.constant 0 : index
    %c0_30 = arith.constant 0 : index
    %c0_31 = arith.constant 0 : index
    %c11 = arith.constant 11 : index
    %17 = vector.load %arg1[%c0_29, %c0_30, %c0_31, %c11] : memref<2x4x3x90xbf16, #tpu.memory_space<vmem>>, vector<1x1x3x78xbf16>
    %18 = vector.shape_cast %17 : vector<1x1x3x78xbf16> to vector<3x78xbf16>
    %19 = tpu.concatenate %2, %4, %6, %8, %10, %12, %14, %16, %18 in 0 : vector<3x78xbf16>, vector<3x78xbf16>, vector<3x78xbf16>, vector<3x78xbf16>, vector<3x78xbf16>, vector<3x78xbf16>, vector<3x78xbf16>, vector<3x78xbf16>, vector<3x78xbf16> -> vector<27x78xbf16>
    %c1_32 = arith.constant 1 : index
    %c0_33 = arith.constant 0 : index
    %c0_34 = arith.constant 0 : index
    %c0_35 = arith.constant 0 : index
    %20 = vector.load %arg1[%c1_32, %c0_33, %c0_34, %c0_35] : memref<2x4x3x90xbf16, #tpu.memory_space<vmem>>, vector<1x1x3x78xbf16>
    %21 = vector.shape_cast %20 : vector<1x1x3x78xbf16> to vector<3x78xbf16>
    %c1_36 = arith.constant 1 : index
    %c1_37 = arith.constant 1 : index
    %c0_38 = arith.constant 0 : index
    %c0_39 = arith.constant 0 : index
    %22 = vector.load %arg1[%c1_36, %c1_37, %c0_38, %c0_39] : memref<2x4x3x90xbf16, #tpu.memory_space<vmem>>, vector<1x1x3x78xbf16>
    %23 = vector.shape_cast %22 : vector<1x1x3x78xbf16> to vector<3x78xbf16>
    %c1_40 = arith.constant 1 : index
    %c0_41 = arith.constant 0 : index
    %c0_42 = arith.constant 0 : index
    %c1_43 = arith.constant 1 : index
    %24 = vector.load %arg1[%c1_40, %c0_41, %c0_42, %c1_43] : memref<2x4x3x90xbf16, #tpu.memory_space<vmem>>, vector<1x1x3x78xbf16>
    %25 = vector.shape_cast %24 : vector<1x1x3x78xbf16> to vector<3x78xbf16>
    %c1_44 = arith.constant 1 : index
    %c2_45 = arith.constant 2 : index
    %c0_46 = arith.constant 0 : index
    %c0_47 = arith.constant 0 : index
    %26 = vector.load %arg1[%c1_44, %c2_45, %c0_46, %c0_47] : memref<2x4x3x90xbf16, #tpu.memory_space<vmem>>, vector<1x1x3x78xbf16>
    %27 = vector.shape_cast %26 : vector<1x1x3x78xbf16> to vector<3x78xbf16>
    %c1_48 = arith.constant 1 : index
    %c3_49 = arith.constant 3 : index
    %c0_50 = arith.constant 0 : index
    %c0_51 = arith.constant 0 : index
    %28 = vector.load %arg1[%c1_48, %c3_49, %c0_50, %c0_51] : memref<2x4x3x90xbf16, #tpu.memory_space<vmem>>, vector<1x1x3x78xbf16>
    %29 = vector.shape_cast %28 : vector<1x1x3x78xbf16> to vector<3x78xbf16>
    %c1_52 = arith.constant 1 : index
    %c2_53 = arith.constant 2 : index
    %c0_54 = arith.constant 0 : index
    %c1_55 = arith.constant 1 : index
    %30 = vector.load %arg1[%c1_52, %c2_53, %c0_54, %c1_55] : memref<2x4x3x90xbf16, #tpu.memory_space<vmem>>, vector<1x1x3x78xbf16>
    %31 = vector.shape_cast %30 : vector<1x1x3x78xbf16> to vector<3x78xbf16>
    %c1_56 = arith.constant 1 : index
    %c0_57 = arith.constant 0 : index
    %c0_58 = arith.constant 0 : index
    %c10_59 = arith.constant 10 : index
    %32 = vector.load %arg1[%c1_56, %c0_57, %c0_58, %c10_59] : memref<2x4x3x90xbf16, #tpu.memory_space<vmem>>, vector<1x1x3x78xbf16>
    %33 = vector.shape_cast %32 : vector<1x1x3x78xbf16> to vector<3x78xbf16>
    %c1_60 = arith.constant 1 : index
    %c1_61 = arith.constant 1 : index
    %c0_62 = arith.constant 0 : index
    %c10_63 = arith.constant 10 : index
    %34 = vector.load %arg1[%c1_60, %c1_61, %c0_62, %c10_63] : memref<2x4x3x90xbf16, #tpu.memory_space<vmem>>, vector<1x1x3x78xbf16>
    %35 = vector.shape_cast %34 : vector<1x1x3x78xbf16> to vector<3x78xbf16>
    %c1_64 = arith.constant 1 : index
    %c0_65 = arith.constant 0 : index
    %c0_66 = arith.constant 0 : index
    %c11_67 = arith.constant 11 : index
    %36 = vector.load %arg1[%c1_64, %c0_65, %c0_66, %c11_67] : memref<2x4x3x90xbf16, #tpu.memory_space<vmem>>, vector<1x1x3x78xbf16>
    %37 = vector.shape_cast %36 : vector<1x1x3x78xbf16> to vector<3x78xbf16>
    %38 = tpu.concatenate %21, %23, %25, %27, %29, %31, %33, %35, %37 in 0 : vector<3x78xbf16>, vector<3x78xbf16>, vector<3x78xbf16>, vector<3x78xbf16>, vector<3x78xbf16>, vector<3x78xbf16>, vector<3x78xbf16>, vector<3x78xbf16>, vector<3x78xbf16> -> vector<27x78xbf16>
    %39 = tpu.concatenate %19, %38 in 1 : vector<27x78xbf16>, vector<27x78xbf16> -> vector<27x156xbf16>
    %cst = arith.constant dense<0.000000e+00> : vector<8x156xf32>
    %40 = tpu.matmul %0, %39, %cst {dimension_numbers = #tpu.dot_dimension_numbers<[1], [0], [0], [1], [0, 0, 1, 1], [], []>} : vector<8x27xbf16>, vector<27x156xbf16>, vector<8x156xf32> -> vector<8x156xf32>
    %cst_68 = arith.constant 0.000000e+00 : f32
    %41 = vector.broadcast %cst_68 : f32 to vector<8x156xf32>
    %42 = arith.cmpf oge, %40, %41 : vector<8x156xf32>
    %cst_69 = arith.constant 2.000000e-01 : f32
    %43 = vector.broadcast %cst_69 : f32 to vector<8x156xf32>
    %44 = arith.mulf %43, %40 : vector<8x156xf32>
    %45 = arith.select %42, %40, %44 : vector<8x156xi1>, vector<8x156xf32>
    %c0_70 = arith.constant 0 : index
    %c0_71 = arith.constant 0 : index
    %46 = vector.load %arg2[%c0_70, %c0_71] : memref<1x156xf32, #tpu.memory_space<vmem>>, vector<1x156xf32>
    %47 = vector.broadcast %46 : vector<1x156xf32> to vector<8x156xf32>
    %48 = arith.mulf %45, %47 : vector<8x156xf32>
    %49 = arith.truncf %48 : vector<8x156xf32> to vector<8x156xbf16>
    %cst_72 = arith.constant 0.000000e+00 : bf16
    %50 = vector.broadcast %cst_72 : bf16 to vector<8x11xbf16>
    %c0_73 = arith.constant 0 : index
    %c0_74 = arith.constant 0 : index
    %51 = vector.load %arg6[%c0_73, %c0_74] : memref<8x204xbf16, #tpu.memory_space<vmem>>, vector<8x11xbf16>
    tpu.vector_store %arg6[%c0_73, %c0_74], %50 {strides = array<i32>} : memref<8x204xbf16, #tpu.memory_space<vmem>>, vector<8x11xbf16>,
    %cst_75 = arith.constant 0.000000e+00 : bf16
    %52 = vector.broadcast %cst_75 : bf16 to vector<8x13xbf16>
    %c0_76 = arith.constant 0 : index
    %c89 = arith.constant 89 : index
    %53 = vector.load %arg6[%c0_76, %c89] : memref<8x204xbf16, #tpu.memory_space<vmem>>, vector<8x13xbf16>
    tpu.vector_store %arg6[%c0_76, %c89], %52 {strides = array<i32>} : memref<8x204xbf16, #tpu.memory_space<vmem>>, vector<8x13xbf16>,
    %54 = vector.extract_strided_slice %49 {offsets = [0, 0], sizes = [8, 78], strides = [1, 1]} : vector<8x156xbf16> to vector<8x78xbf16>
    %c0_77 = arith.constant 0 : index
    %c11_78 = arith.constant 11 : index
    %55 = vector.load %arg6[%c0_77, %c11_78] : memref<8x204xbf16, #tpu.memory_space<vmem>>, vector<8x78xbf16>
    tpu.vector_store %arg6[%c0_77, %c11_78], %54 {strides = array<i32>} : memref<8x204xbf16, #tpu.memory_space<vmem>>, vector<8x78xbf16>,
    %cst_79 = arith.constant 0.000000e+00 : bf16
    %56 = vector.broadcast %cst_79 : bf16 to vector<8x11xbf16>
    %c0_80 = arith.constant 0 : index
    %c102 = arith.constant 102 : index
    %57 = vector.load %arg6[%c0_80, %c102] : memref<8x204xbf16, #tpu.memory_space<vmem>>, vector<8x11xbf16>
    tpu.vector_store %arg6[%c0_80, %c102], %56 {strides = array<i32>} : memref<8x204xbf16, #tpu.memory_space<vmem>>, vector<8x11xbf16>,
    %cst_81 = arith.constant 0.000000e+00 : bf16
    %58 = vector.broadcast %cst_81 : bf16 to vector<8x13xbf16>
    %c0_82 = arith.constant 0 : index
    %c191 = arith.constant 191 : index
    %59 = vector.load %arg6[%c0_82, %c191] : memref<8x204xbf16, #tpu.memory_space<vmem>>, vector<8x13xbf16>
    tpu.vector_store %arg6[%c0_82, %c191], %58 {strides = array<i32>} : memref<8x204xbf16, #tpu.memory_space<vmem>>, vector<8x13xbf16>,
    %60 = vector.extract_strided_slice %49 {offsets = [0, 78], sizes = [8, 78], strides = [1, 1]} : vector<8x156xbf16> to vector<8x78xbf16>
    %c0_83 = arith.constant 0 : index
    %c113 = arith.constant 113 : index
    %61 = vector.load %arg6[%c0_83, %c113] : memref<8x204xbf16, #tpu.memory_space<vmem>>, vector<8x78xbf16>
    tpu.vector_store %arg6[%c0_83, %c113], %60 {strides = array<i32>} : memref<8x204xbf16, #tpu.memory_space<vmem>>, vector<8x78xbf16>,
    %c0_84 = arith.constant 0 : index
    %c0_85 = arith.constant 0 : index
    %62 = vector.load %arg4[%c0_84, %c0_85] : memref<8x72xbf16, #tpu.memory_space<vmem>>, vector<8x72xbf16>
    %c0_86 = arith.constant 0 : index
    %c0_87 = arith.constant 0 : index
    %63 = vector.load %arg6[%c0_86, %c0_87] : memref<8x204xbf16, #tpu.memory_space<vmem>>, vector<8x80xbf16>
    %c0_88 = arith.constant 0 : index
    %c1_89 = arith.constant 1 : index
    %64 = vector.load %arg6[%c0_88, %c1_89] : memref<8x204xbf16, #tpu.memory_space<vmem>>, vector<8x80xbf16>
    %c0_90 = arith.constant 0 : index
    %c2_91 = arith.constant 2 : index
    %65 = vector.load %arg6[%c0_90, %c2_91] : memref<8x204xbf16, #tpu.memory_space<vmem>>, vector<8x80xbf16>
    %c0_92 = arith.constant 0 : index
    %c10_93 = arith.constant 10 : index
    %66 = vector.load %arg6[%c0_92, %c10_93] : memref<8x204xbf16, #tpu.memory_space<vmem>>, vector<8x80xbf16>
    %c0_94 = arith.constant 0 : index
    %c11_95 = arith.constant 11 : index
    %67 = vector.load %arg6[%c0_94, %c11_95] : memref<8x204xbf16, #tpu.memory_space<vmem>>, vector<8x80xbf16>
    %c0_96 = arith.constant 0 : index
    %c12 = arith.constant 12 : index
    %68 = vector.load %arg6[%c0_96, %c12] : memref<8x204xbf16, #tpu.memory_space<vmem>>, vector<8x80xbf16>
    %c0_97 = arith.constant 0 : index
    %c20 = arith.constant 20 : index
    %69 = vector.load %arg6[%c0_97, %c20] : memref<8x204xbf16, #tpu.memory_space<vmem>>, vector<8x80xbf16>
    %c0_98 = arith.constant 0 : index
    %c21 = arith.constant 21 : index
    %70 = vector.load %arg6[%c0_98, %c21] : memref<8x204xbf16, #tpu.memory_space<vmem>>, vector<8x80xbf16>
    %c0_99 = arith.constant 0 : index
    %c22 = arith.constant 22 : index
    %71 = vector.load %arg6[%c0_99, %c22] : memref<8x204xbf16, #tpu.memory_space<vmem>>, vector<8x80xbf16>
    %72 = tpu.concatenate %63, %64, %65, %66, %67, %68, %69, %70, %71 in 0 : vector<8x80xbf16>, vector<8x80xbf16>, vector<8x80xbf16>, vector<8x80xbf16>, vector<8x80xbf16>, vector<8x80xbf16>, vector<8x80xbf16>, vector<8x80xbf16>, vector<8x80xbf16> -> vector<72x80xbf16>
    %c0_100 = arith.constant 0 : index
    %c102_101 = arith.constant 102 : index
    %73 = vector.load %arg6[%c0_100, %c102_101] : memref<8x204xbf16, #tpu.memory_space<vmem>>, vector<8x80xbf16>
    %c0_102 = arith.constant 0 : index
    %c103 = arith.constant 103 : index
    %74 = vector.load %arg6[%c0_102, %c103] : memref<8x204xbf16, #tpu.memory_space<vmem>>, vector<8x80xbf16>
    %c0_103 = arith.constant 0 : index
    %c104 = arith.constant 104 : index
    %75 = vector.load %arg6[%c0_103, %c104] : memref<8x204xbf16, #tpu.memory_space<vmem>>, vector<8x80xbf16>
    %c0_104 = arith.constant 0 : index
    %c112 = arith.constant 112 : index
    %76 = vector.load %arg6[%c0_104, %c112] : memref<8x204xbf16, #tpu.memory_space<vmem>>, vector<8x80xbf16>
    %c0_105 = arith.constant 0 : index
    %c113_106 = arith.constant 113 : index
    %77 = vector.load %arg6[%c0_105, %c113_106] : memref<8x204xbf16, #tpu.memory_space<vmem>>, vector<8x80xbf16>
    %c0_107 = arith.constant 0 : index
    %c114 = arith.constant 114 : index
    %78 = vector.load %arg6[%c0_107, %c114] : memref<8x204xbf16, #tpu.memory_space<vmem>>, vector<8x80xbf16>
    %c0_108 = arith.constant 0 : index
    %c122 = arith.constant 122 : index
    %79 = vector.load %arg6[%c0_108, %c122] : memref<8x204xbf16, #tpu.memory_space<vmem>>, vector<8x80xbf16>
    %c0_109 = arith.constant 0 : index
    %c123 = arith.constant 123 : index
    %80 = vector.load %arg6[%c0_109, %c123] : memref<8x204xbf16, #tpu.memory_space<vmem>>, vector<8x80xbf16>
    %c0_110 = arith.constant 0 : index
    %c124 = arith.constant 124 : index
    %81 = vector.load %arg6[%c0_110, %c124] : memref<8x204xbf16, #tpu.memory_space<vmem>>, vector<8x80xbf16>
    %82 = tpu.concatenate %73, %74, %75, %76, %77, %78, %79, %80, %81 in 0 : vector<8x80xbf16>, vector<8x80xbf16>, vector<8x80xbf16>, vector<8x80xbf16>, vector<8x80xbf16>, vector<8x80xbf16>, vector<8x80xbf16>, vector<8x80xbf16>, vector<8x80xbf16> -> vector<72x80xbf16>
    %83 = tpu.concatenate %72, %82 in 1 : vector<72x80xbf16>, vector<72x80xbf16> -> vector<72x160xbf16>
    %cst_111 = arith.constant dense<0.000000e+00> : vector<8x160xf32>
    %84 = tpu.matmul %62, %83, %cst_111 {dimension_numbers = #tpu.dot_dimension_numbers<[1], [0], [0], [1], [0, 0, 1, 1], [], []>} : vector<8x72xbf16>, vector<72x160xbf16>, vector<8x160xf32> -> vector<8x160xf32>
    %85 = vector.extract_strided_slice %84 {offsets = [0, 0], sizes = [8, 80], strides = [1, 1]} : vector<8x160xf32> to vector<8x80xf32>
    %c0_112 = arith.constant 0 : index
    %c0_113 = arith.constant 0 : index
    %c0_114 = arith.constant 0 : index
    %86 = vector.load %arg5[%c0_112, %c0_113, %c0_114] : memref<2x8x80xf32, #tpu.memory_space<vmem>>, vector<1x8x80xf32>
    %87 = vector.shape_cast %86 : vector<1x8x80xf32> to vector<8x80xf32>
    %88 = vector.shape_cast %85 : vector<8x80xf32> to vector<1x8x80xf32>
    tpu.vector_store %arg5[%c0_112, %c0_113, %c0_114], %88 {strides = array<i32>} : memref<2x8x80xf32, #tpu.memory_space<vmem>>, vector<1x8x80xf32>,
    %89 = vector.extract_strided_slice %84 {offsets = [0, 80], sizes = [8, 80], strides = [1, 1]} : vector<8x160xf32> to vector<8x80xf32>
    %c1_115 = arith.constant 1 : index
    %c0_116 = arith.constant 0 : index
    %c0_117 = arith.constant 0 : index
    %90 = vector.load %arg5[%c1_115, %c0_116, %c0_117] : memref<2x8x80xf32, #tpu.memory_space<vmem>>, vector<1x8x80xf32>
    %91 = vector.shape_cast %90 : vector<1x8x80xf32> to vector<8x80xf32>
    %92 = vector.shape_cast %89 : vector<8x80xf32> to vector<1x8x80xf32>
    tpu.vector_store %arg5[%c1_115, %c0_116, %c0_117], %92 {strides = array<i32>} : memref<2x8x80xf32, #tpu.memory_space<vmem>>, vector<1x8x80xf32>,
    return
  }
  func.func @transform_0(%arg0: i32) -> (i32, i32, i32, i32) {
    %c0_i32 = arith.constant 0 : i32
    %c0_i32_0 = arith.constant 0 : i32
    %c0_i32_1 = arith.constant 0 : i32
    %c0_i32_2 = arith.constant 0 : i32
    return %arg0, %c0_i32, %c0_i32_0, %c0_i32_1 : i32, i32, i32, i32
  }
  func.func @transform_1(%arg0: i32) -> (i32, i32) {
    %c0_i32 = arith.constant 0 : i32
    %c0_i32_0 = arith.constant 0 : i32
    %c0_i32_1 = arith.constant 0 : i32
    return %c0_i32, %c0_i32_0 : i32, i32
  }
  func.func @transform_2(%arg0: i32) -> (i32, i32) {
    %c0_i32 = arith.constant 0 : i32
    %c0_i32_0 = arith.constant 0 : i32
    %c0_i32_1 = arith.constant 0 : i32
    return %c0_i32, %c0_i32_0 : i32, i32
  }
  func.func @transform_3(%arg0: i32) -> (i32, i32) {
    %c0_i32 = arith.constant 0 : i32
    %c0_i32_0 = arith.constant 0 : i32
    %c0_i32_1 = arith.constant 0 : i32
    return %c0_i32, %c0_i32_0 : i32, i32
  }
  func.func @transform_4(%arg0: i32) -> (i32, i32, i32) {
    %c0_i32 = arith.constant 0 : i32
    %c0_i32_0 = arith.constant 0 : i32
    %c0_i32_1 = arith.constant 0 : i32
    return %arg0, %c0_i32, %c0_i32_0 : i32, i32, i32
  }
}

</mosaic_0001>

<bundles_post_ra>
// kernel: tpu_custom_call.1
= control target key start
LH: loop header
LB: loop body
LE: loop exit
PB: predicated region body
PF: predicated region fallthrough
CT: control target
= control target key end

     0   :  { %s842_s0 = inlined_call_operand.vmem [shape: bf16[2,4,3,90], index: 0, kind: input, shape index: {}]   ;;  %s843_s1 = inlined_call_operand.vmem [shape: f32[1,156], index: 1, kind: input, shape index: {}]   ;;  %s844_s2 = inlined_call_operand.vmem [shape: bf16[8,27], index: 2, kind: input, shape index: {}]   ;;  %s845_s3 = inlined_call_operand.vmem [shape: bf16[8,72], index: 3, kind: input, shape index: {}]   ;;  %s846_s4 = inlined_call_operand.hbm [shape: f32[2,8,80], index: 4, kind: output, shape index: {}]  }
   0x1   :  { %v546_v0 = vld [vmem:[%s842_s0 + $0x2] sm:$0x3] }
   0x2   :  { %28 = vst [vmem:[#allocation1] ss:$4 sm:$0xff] %v546_v0 }
   0x3   :  { %9 = vsyncpa [#allocation4], 0  ;;  %v648_v1 = vld [vmem:[%s842_s0] sm:$0x3]  ;;  %v547_v3 = vld [vmem:[%s842_s0 + $0x4] sm:$0x3] }
   0x4   :  { %v548_v5 = vld [vmem:[%s842_s0 + $0x6] sm:$0x3]  ;;  %v550_v11 = vld [vmem:[%s842_s0 + $0xa] sm:$0x3]  ;;  %v673_v13 = vld [vmem:[%s842_s0 + $0x8] sm:$0x3] }
   0x5   :  { %v551_v15 = vld [vmem:[%s842_s0 + $0xc] sm:$0x3]  ;;  %v552_v17 = vld [vmem:[%s842_s0 + $0xe] sm:$0x3]  ;;  %s600_s5 = smov 127   ;;  %s601_s0 = smov 118  }
   0x6   :  { %s602_s6 = smov 117   ;;  %vm97_vm0 = vcmask 1041408   ;;  %vm98_vm1 = vsmask.f32 1280  ;;  %vm118_vm2 = vcmask 1040384   ;;  %vm101_vm3 = vcmask 1042432  }
   0x7   :  { %vm124_vm4 = vsmask.f32 2304  ;;  %vm703_vm5 = vmand %vm97_vm0, %vm98_vm1  ;;  %vm106_vm7 = vcmask 1044480   ;;  %vm107_vm8 = vsmask.f32 4352  ;;  %vm127_vm9 = vcmask 1043456  }
   0x8   :  { %vm709_vm6 = vmand %vm101_vm3, %vm124_vm4  ;;  %s603_s7 = smov 78   ;;  %vm110_vm11 = vcmask 1045504   ;;  %vm114_vm12 = vcmask 1047552   ;;  %vm115_vm13 = vsmask.f32 7424  ;;  %vm234_vm15 = vcmask 637952  }
   0x9   :  { %v650_v2 = vld.sshfl [vmem:[#allocation1] sm:$0xff pattern:$0x73625140]  ;;  %vm719_vm10 = vmand %vm106_vm7, %vm107_vm8  ;;  %vm241_vm0 = vcmask 220160   ;;  %s606_s12 = smov 35   ;;  %vm295_vm4 = vcmask 831176  }
   0xa   :  { %39 = vst [vmem:[#allocation1] ss:$4 sm:$0xff] %v648_v1  ;;  %vm727_vm14 = vmand %vm114_vm12, %vm115_vm13  ;;  %vm301_vm8 = vcmask 724056   ;;  %s609_s13 = smov 108   ;;  %s610_s14 = smov 107   ;;  %vm402_vm13 = vcmask 867328  }
   0xb   :  { %s611_s15 = smov 116   ;;  %s612_s16 = smov 126  }
   0xc   :  { %s613_s19 = smov 48   ;;  %s534_s23 = sshll.u32 %s846_s4, 4  ;;  %s535_s23 = int_to_ptr.hbm [resolvable:$true] %s534_s23 }
   0xd   :  { %s615_s24 = smov 128   ;;  %s616_s25 = smov 8  }
  0x11   :  { %v656_v4 = vld.sshfl [vmem:[#allocation1] sm:$0xff pattern:$0x73625140] }
  0x12   :  { %46 = vst [vmem:[#allocation1] ss:$4 sm:$0xff] %v547_v3  ;;  %v42_v48 = vrot.slane %v656_v4, 5 }
  0x19   :  { %v661_v6 = vld.sshfl [vmem:[#allocation1] sm:$0xff pattern:$0x73625140] }
  0x1a   :  { %58 = vst [vmem:[#allocation1 + $0x3] ss:$4 sm:$0xff] %v548_v5 }
  0x21   :  { %v663_v7 = vld.sshfl [vmem:[#allocation1] sm:$0xff pattern:$0x73625140] }
  0x22   :  { %60 = vst [vmem:[#allocation1] ss:$4 sm:$0xff] %v547_v3 }
  0x29   :  { %v61_v8 = vld.sshfl [vmem:[#allocation1] sm:$0xff pattern:$0x73625140] }
  0x2a   :  { %73 = vst [vmem:[#allocation1] ss:$4 sm:$0xff] %v648_v1  ;;  %v62_v35 = vshll.u32 %v61_v8, 16  ;;  %v65_v36 = vshrl.u32 %v61_v8, 16 }
  0x2c   :  { %v64_v37 = vrot.slane %v62_v35, 1 }
  0x2e   :  { %v67_v38 = vor.u32 %v65_v36, %v64_v37 }
  0x31   :  { %v74_v9 = vld.sshfl [vmem:[#allocation1] sm:$0xff pattern:$0x73625140] }
  0x32   :  { %79 = vst [vmem:[#allocation1] ss:$4 sm:$0xff] %v546_v0  ;;  %v76_v39 = vrot.slane %v74_v9, 7 }
  0x39   :  { %v80_v10 = vld.sshfl [vmem:[#allocation1] sm:$0xff pattern:$0x73625140] }
  0x3a   :  { %92 = vst [vmem:[#allocation1 + $0x2] ss:$4 sm:$0xff] %v648_v1  ;;  %v81_v40 = vshrl.u32 %v80_v10, 16  ;;  %v84_v41 = vshll.u32 %v80_v10, 16 }
  0x3c   :  { %v83_v42 = vrot.slane %v81_v40, 5  ;;  %v86_v43 = vrot.slane %v84_v41, 6 }
  0x3e   :  { %v87_v44 = vor.u32 %v86_v43, %v83_v42 }
  0x41   :  { %v93_v12 = vld.sshfl [vmem:[#allocation1] sm:$0xff pattern:$0x73625140] }
  0x42   :  { %140 = vst [vmem:[#allocation1] ss:$4 sm:$0xff] %v550_v11 }
  0x49   :  { %v141_v14 = vld.sshfl [vmem:[#allocation1] sm:$0xff pattern:$0x73625140] }
  0x4a   :  { %151 = vst [vmem:[#allocation1] ss:$4 sm:$0xff] %v673_v13  ;;  %v142_v46 = vshrl.u32 %v141_v14, 16  ;;  %v145_v47 = vshll.u32 %v141_v14, 16  ;;  %v30_v14 = vshrl.u32 %v650_v2, 16 }
  0x4c   :  { %v144_v49 = vrot.slane %v142_v46, 6  ;;  %v147_v50 = vrot.slane %v145_v47, 7 }
  0x4e   :  { %v148_v54 = vor.u32 %v147_v50, %v144_v49 }
  0x50   :  { %v209_v62 = vsel %vm703_vm5, %v673_v13, %v148_v54 }
  0x51   :  { %v152_v16 = vld.sshfl [vmem:[#allocation1] sm:$0xff pattern:$0x73625140] }
  0x52   :  { %158 = vst [vmem:[#allocation1] ss:$4 sm:$0xff] %v551_v15  ;;  %v154_v20 = vrot.slane %v152_v16, 5 }
  0x54   :  { %155 = vrot.lane.b32.xlu2 %v154_v20, %s600_s5 }
  0x59   :  { %v682_v18 = vld.sshfl [vmem:[#allocation1] sm:$0xff pattern:$0x73625140] }
  0x5a   :  { %170 = vst [vmem:[#allocation1 + $0x3] ss:$4 sm:$0xff] %v552_v17  ;;  %v160_v51 = vshrl.u32 %v682_v18, 16  ;;  %v163_v52 = vshll.u32 %v682_v18, 16  ;;  %v32_v18 = vrot.slane %v30_v14, 6 }
  0x5c   :  { %v162_v57 = vrot.slane %v160_v51, 3  ;;  %v165_v58 = vrot.slane %v163_v52, 4 }
  0x5e   :  { %v166_v63 = vor.u32 %v165_v58, %v162_v57  ;;  %v607_v58 = vmov 0  }
  0x61   :  { %v684_v19 = vld.sshfl [vmem:[#allocation1] sm:$0xff pattern:$0x73625140] }
  0x62   :  { %172 = vst [vmem:[#allocation1] ss:$4 sm:$0xff] %v551_v15  ;;  %v33_v15 = vshll.u32 %v650_v2, 16 }
  0x64   :  { %v35_v20 = vrot.slane %v33_v15, 7 }
  0x69   :  { %v173_v21 = vld.sshfl [vmem:[#allocation1] sm:$0xff pattern:$0x73625140] }
  0x6a   :  { %v174_v22 = vshll.u32 %v173_v21, 16  ;;  %v177_v23 = vshrl.u32 %v173_v21, 16  ;;  %185 = vst [vmem:[#allocation1] ss:$4 sm:$0xff] %v673_v13  ;;  %v48_v21 = vshrl.u32 %v661_v6, 16 }
  0x6c   :  { %v176_v24 = vrot.slane %v174_v22, 1  ;;  %v51_v22 = vshll.u32 %v661_v6, 16 }
  0x6e   :  { %v179_v25 = vor.u32 %v177_v23, %v176_v24  ;;  %180 = vrot.lane.b32.xlu2 %v176_v24, %s600_s5  ;;  %v36_v24 = vor.u32 %v35_v20, %v32_v18 }
  0x70   :  { %182 = vrot.lane.b32.xlu0 %v179_v25, %s600_s5  ;;  %v50_v25 = vrot.slane %v48_v21, 3 }
  0x71   :  { %v186_v26 = vld.sshfl [vmem:[#allocation1] sm:$0xff pattern:$0x73625140] }
  0x72   :  { %191 = vst [vmem:[#allocation1] ss:$4 sm:$0xff] %v550_v11  ;;  %v188_v27 = vrot.slane %v186_v26, 7 }
  0x76   :  { %88 = vrot.lane.b32.xlu2 %v87_v44, %s601_s0  ;;  %v19_v44 = vld [vmem:[%s844_s2] sm:$0xf]  ;;  %s605_s2 = smov 11  }
  0x78   :  { %189 = vrot.lane.b32.xlu0 %v188_v27, %s601_s0  ;;  %v100_v27 = vsel %vm703_vm5, %v648_v1, %v36_v24  ;;  %vm305_vm5 = vcmask 617976  }
  0x79   :  { %v192_v28 = vld.sshfl [vmem:[#allocation1] sm:$0xff pattern:$0x73625140]  ;;  %306 = vst.msk [vmem:[#allocation2 + $0x4] sm:$0xf] %vm305_vm5, %v607_v58  ;;  %vm465_vm5 = vcmask 654336  }
  0x7a   :  { %v193_v29 = vshrl.u32 %v192_v28, 16  ;;  %v196_v30 = vshll.u32 %v192_v28, 16  ;;  %204 = vst [vmem:[#allocation1 + $0x2] ss:$4 sm:$0xff] %v673_v13 }
  0x7c   :  { %v195_v31 = vrot.slane %v193_v29, 5  ;;  %v198_v32 = vrot.slane %v196_v30, 6  ;;  %v604_v29 = vmov 65535  }
  0x7d   :  { %v246_v30 = vsel %vm106_vm7, 4294967295, %v604_v29  ;;  %vm314_vm7 = vcmask 515076  }
  0x7e   :  { %v199_v33 = vor.u32 %v198_v32, %v195_v31  ;;  %43 = vrot.lane.b32.xlu2 %v42_v48, %s600_s5 }
  0x80   :  { %200 = vrot.lane.b32.xlu1 %v199_v33, %s601_s0  ;;  %70 = vrot.lane.b32.xlu0 %v67_v38, %s600_s5  ;;  %v247_v33 = vsel %vm110_vm11, %v246_v30, 0 }
  0x81   :  { %v205_v34 = vld.sshfl [vmem:[#allocation1] sm:$0xff pattern:$0x73625140] }
  0x88   :  { %207 = vrot.lane.b32.xlu1 %v205_v34, %s602_s6  ;;  %95 = vrot.lane.b32.xlu0 %v93_v12, %s602_s6 }
  0x90   :  { %77 = vrot.lane.b32.xlu1 %v76_v39, %s601_s0  ;;  %68 = vrot.lane.b32.xlu0 %v64_v37, %s600_s5 }
  0xae   :  { %v156_v59 = vpop.permute.xlu2 %155 }
  0xaf   :  { %v212_v4 = vsel %vm101_vm3, %v209_v62, %v156_v59 }
  0xb0   :  { %v214_v9 = vsel %vm719_vm10, %v212_v4, %v166_v63 }
  0xb1   :  { %v216_v12 = vsel %vm110_vm11, %v214_v9, %v684_v19  ;;  %v53_v19 = vrot.slane %v51_v22, 4 }
  0xb3   :  { %v54_v31 = vor.u32 %v53_v19, %v50_v25 }
  0xc8   :  { %v181_v10 = vpop.permute.xlu2 %180 }
  0xc9   :  { %v218_v13 = vsel %vm727_vm14, %v216_v12, %v181_v10 }
  0xd0   :  { %v89_v17 = vpop.permute.xlu2 %88 }
  0xd8   :  { %v44_v28 = vpop.permute.xlu2 %43 }
  0xd9   :  { %v104_v6 = vsel %vm101_vm3, %v100_v27, %v44_v28  ;;  %vm293_vm3 = vcmask 84992  }
  0xda   :  { %v109_v1 = vsel %vm719_vm10, %v104_v6, %v54_v31  ;;  %294 = vst.msk [vmem:[#allocation2] sm:$0xf] %vm293_vm3, %v607_v58  ;;  %vm310_vm10 = vcmask 285696   ;;  %vm372_vm3 = vcmask 965632  }
  0xdb   :  { %v112_v40 = vsel %vm110_vm11, %v109_v1, %v663_v7  ;;  %296 = vst.msk [vmem:[#allocation2] sm:$0xf] %vm295_vm4, %v607_v58  ;;  %vm303_vm11 = vcmask 921392   ;;  %vm360_vm4 = vcmask 1039360  }
  0xe2   :  { %v183_v45 = vpop.permute.xlu0 %182 }
  0xea   :  { %v190_v55 = vpop.permute.xlu0 %189 }
  0xeb   :  { %v221_v60 = vsel %vm118_vm2, %v183_v45, %v190_v55  ;;  %v284_v45 = vld [vmem:[%s843_s1] sm:$0x3]  ;;  %s608_s1 = smov 106  }
  0xec   :  { %v287_v46 = vperm.slane %v284_v45, 1  ;;  %v286_v49 = vperm.slane %v284_v45, 0 }
  0xf2   :  { %v201_v53 = vpop.permute.xlu1 %200  ;;  %v71_v16 = vpop.permute.xlu0 %70 }
  0xf3   :  { %v223_v0 = vsel %vm709_vm6, %v221_v60, %v201_v53 }
  0xfa   :  { %v208_v5 = vpop.permute.xlu1 %207  ;;  %v96_v2 = vpop.permute.xlu0 %95 }
  0xfb   :  { %v226_v8 = vsel %vm127_vm9, %v223_v0, %v208_v5 }
  0xfc   :  { %231 = vrot.lane.b32.xlu1 %v226_v8, %s603_s7 }
 0x102   :  { %v78_v23 = vpop.permute.xlu1 %77  ;;  %v69_v39 = vpop.permute.xlu0 %68 }
 0x103   :  { %v121_v26 = vsel %vm118_vm2, %v71_v16, %v78_v23  ;;  %v117_v41 = vsel %vm727_vm14, %v112_v40, %v69_v39  ;;  %vm396_vm14 = vcmask 875520  }
 0x104   :  { %229 = vrot.lane.b32.xlu1 %v218_v13, %s603_s7  ;;  %v126_v32 = vsel %vm709_vm6, %v121_v26, %v89_v17  ;;  %vm313_vm6 = vcmask 1044360  }
 0x105   :  { %v130_v34 = vsel %vm127_vm9, %v126_v32, %v96_v2  ;;  %vm315_vm12 = vmor %vm314_vm7, %vm313_vm6  ;;  %vm481_vm6 = vcmask 588800  }
 0x16e   :  { %v232_v35 = vpop.permute.xlu1 %231 }
 0x16f   :  { %v250_v36 = vand.u32 %v247_v33, %v232_v35  ;;  %v240_v37 = vsel %vm234_vm15, %v130_v34, %v232_v35 }
 0x170   :  { %v248_v38 = vand.u32 %v247_v33, %v240_v37 }
 0x171   :  { %271 = vmatpush.bf16.msra.mxu1 %v250_v36 }
 0x172   :  { %258 = vmatpush.bf16.msra.mxu0 %v248_v38 }
 0x176   :  { %v230_v42 = vpop.permute.xlu1 %229 }
 0x177   :  { %272 = vmatpush.bf16.msra.mxu1 %v230_v42  ;;  %v237_v43 = vsel %vm234_vm15, %v117_v41, %v230_v42  ;;  %vm390_vm15 = vcmask 883712  }
 0x178   :  { %259 = vmatpush.bf16.msra.mxu0 %v237_v43 }
 0x17a   :  { %554 = vmatmul.msk.bf16.vlgmr.msra.gmra.mxu1 %vm241_vm0, %v19_v44 }
 0x17b   :  { %553 = vmatmul.msk.bf16.vlgmr.msra.gmra.mxu0 %vm241_vm0, %v19_v44  ;;  %vm378_vm0 = vcmask 957440  }
 0x1f7   :  { %v274_v7 = vpop.f32.mrf.mxu1 }
 0x1f8   :  { %vm279_vm1 = vcmp.ge.f32.partialorder %v274_v7, 0.0  ;;  %v281_v47 = vmul.f32 0.2, %v274_v7  ;;  %v261_v48 = vpop.f32.mrf.mxu0 }
 0x1f9   :  { %vm278_vm2 = vcmp.ge.f32.partialorder %v261_v48, 0.0  ;;  %v280_v50 = vmul.f32 0.2, %v261_v48 }
 0x1fa   :  { %v283_v51 = vsel %vm279_vm1, %v274_v7, %v281_v47  ;;  %vm384_vm1 = vcmask 949248  }
 0x1fb   :  { %v291_v52 = vmul.f32 %v287_v46, %v283_v51  ;;  %v282_v53 = vsel %vm278_vm2, %v261_v48, %v280_v50  ;;  %vm366_vm2 = vcmask 1031168  }
 0x1fc   :  { %v290_v54 = vmul.f32 %v286_v49, %v282_v53 }
 0x1fe   :  { %v292_v55 = vpack.c.bf16 %v291_v52, %v290_v54 }
 0x1ff   :  { %v276_v56 = vpop.f32.mrf.mxu1 }
 0x200   :  { %298 = vrot.lane.b32.xlu0 %v292_v55, %s605_s2  ;;  %307 = vrot.lane.b32.xlu2 %v292_v55, %s606_s12  ;;  %v263_v57 = vpop.f32.mrf.mxu0 }
 0x25a   :  { %v308_v59 = vpop.permute.xlu2 %307 }
 0x25b   :  { %v309_v60 = vrot.slane %v308_v59, 4 }
 0x25d   :  { %v311_v62 = vsel %vm310_vm10, %v309_v60, %v308_v59 }
 0x272   :  { %v299_v61 = vpop.permute.xlu0 %298 }
 0x273   :  { %302 = vst.msk [vmem:[#allocation2] sm:$0xf] %vm301_vm8, %v299_v61 }
 0x274   :  { %304 = vst.msk [vmem:[#allocation2] sm:$0xf] %vm303_vm11, %v607_v58 }
 0x275   :  { %316 = vst.msk [vmem:[#allocation2] sm:$0xff] %vm315_vm12, %v311_v62 }
 0x27c   :  { %v350_v63 = vld [vmem:[#allocation2] sm:$0xff] }
 0x27d   :  { %v353_v0 = vunpack.c.h.b16 %v350_v63  ;;  %v352_v3 = vunpack.c.l.b16 %v350_v63  ;;  %v781_v8 = vld [vmem:[#allocation2] sm:$0xf] }
 0x27e   :  { %v320_v9 = vunpack.c.l.b16 %v781_v8 }
 0x27f   :  { %v761_v4 = vpack.c.b16 %v353_v0, %v353_v0  ;;  %v763_v5 = vpack.c.b16 %v352_v3, %v352_v3 }
 0x280   :  { %v321_v10 = vpack.c.b16 %v320_v9, %v320_v9 }
 0x281   :  { %400 = vrot.lane.b32.xlu2 %v761_v4, %s608_s1  ;;  %386 = vrot.lane.b32.xlu0 %v763_v5, %s609_s13 }
 0x282   :  { %398 = vrot.lane.b32.xlu1 %v763_v5, %s608_s1 }
 0x289   :  { %392 = vrot.lane.b32.xlu2 %v763_v5, %s610_s14  ;;  %394 = vrot.lane.b32.xlu0 %v761_v4, %s610_s14 }
 0x28a   :  { %388 = vrot.lane.b32.xlu1 %v761_v4, %s609_s13 }
 0x291   :  { %376 = vrot.lane.b32.xlu2 %v761_v4, %s602_s6  ;;  %380 = vrot.lane.b32.xlu0 %v763_v5, %s611_s15 }
 0x292   :  { %374 = vrot.lane.b32.xlu1 %v763_v5, %s602_s6 }
 0x299   :  { %362 = vrot.lane.b32.xlu2 %v763_v5, %s612_s16  ;;  %364 = vrot.lane.b32.xlu0 %v761_v4, %s612_s16 }
 0x29a   :  { %382 = vrot.lane.b32.xlu1 %v761_v4, %s611_s15 }
 0x2a1   :  { %370 = vrot.lane.b32.xlu2 %v761_v4, %s601_s0  ;;  %356 = vrot.lane.b32.xlu0 %v763_v5, %s600_s5 }
 0x2a2   :  { %368 = vrot.lane.b32.xlu1 %v763_v5, %s601_s0 }
 0x2a9   :  { %334 = vrot.lane.b32.xlu0 %v321_v10, %s610_s14  ;;  %332 = vrot.lane.b32.xlu2 %v321_v10, %s609_s13 }
 0x2aa   :  { %358 = vrot.lane.b32.xlu1 %v761_v4, %s600_s5 }
 0x2b1   :  { %328 = vrot.lane.b32.xlu0 %v321_v10, %s602_s6  ;;  %326 = vrot.lane.b32.xlu2 %v321_v10, %s601_s0 }
 0x2b2   :  { %336 = vrot.lane.b32.xlu1 %v321_v10, %s608_s1 }
 0x2ba   :  { %330 = vrot.lane.b32.xlu1 %v321_v10, %s611_s15 }
 0x2c2   :  { %324 = vrot.lane.b32.xlu1 %v321_v10, %s612_s16 }
 0x2db   :  { %v401_v11 = vpop.permute.xlu2 %400 }
 0x2dc   :  { %454 = vrot.lane.b32.xlu0 %v401_v11, %s608_s1 }
 0x2e3   :  { %v393_v12 = vpop.permute.xlu2 %392 }
 0x2eb   :  { %v377_v16 = vpop.permute.xlu2 %376 }
 0x2f3   :  { %v387_v13 = vpop.permute.xlu0 %386  ;;  %v363_v24 = vpop.permute.xlu2 %362 }
 0x2f4   :  { %v399_v14 = vpop.permute.xlu1 %398 }
 0x2f5   :  { %v403_v15 = vsel %vm402_vm13, %v399_v14, %v401_v11  ;;  %v317_v11 = vld [vmem:[%s845_s3] sm:$0xf]  ;;  %s614_s3 = smov [#allocation3]  }
 0x2f6   :  { %452 = vrot.lane.b32.xlu2 %v403_v15, %s608_s1  ;;  %s532_s20 = sshll.u32 %s614_s3, 4  ;;  %s533_s20 = int_to_ptr.vmem [resolvable:$true] %s532_s20 }
 0x2fb   :  { %v395_v17 = vpop.permute.xlu0 %394  ;;  %v371_v26 = vpop.permute.xlu2 %370 }
 0x2fc   :  { %v397_v18 = vsel %vm396_vm14, %v393_v12, %v395_v17  ;;  %v389_v20 = vpop.permute.xlu1 %388 }
 0x2fd   :  { %v391_v21 = vsel %vm390_vm15, %v387_v13, %v389_v20  ;;  %v427_v22 = vsel %vm127_vm9, %v389_v20, %v395_v17 }
 0x2fe   :  { %450 = vrot.lane.b32.xlu2 %v427_v22, %s608_s1  ;;  %v424_v23 = vsel %vm127_vm9, %v391_v21, %v397_v18 }
 0x2ff   :  { %448 = vrot.lane.b32.xlu1 %v424_v23, %s608_s1 }
 0x303   :  { %v381_v25 = vpop.permute.xlu0 %380  ;;  %v333_v41 = vpop.permute.xlu2 %332 }
 0x304   :  { %v375_v19 = vpop.permute.xlu1 %374 }
 0x305   :  { %v379_v29 = vsel %vm378_vm0, %v375_v19, %v377_v16 }
 0x30b   :  { %v365_v27 = vpop.permute.xlu0 %364  ;;  %v327_v43 = vpop.permute.xlu2 %326 }
 0x30c   :  { %v383_v28 = vpop.permute.xlu1 %382  ;;  %v415_v2 = vsel %vm127_vm9, %v365_v27, %v371_v26  ;;  %v367_v33 = vsel %vm366_vm2, %v363_v24, %v365_v27 }
 0x30d   :  { %v385_v30 = vsel %vm384_vm1, %v381_v25, %v383_v28  ;;  %v421_v31 = vsel %vm127_vm9, %v377_v16, %v383_v28  ;;  %442 = vrot.lane.b32.xlu1 %v415_v2, %s608_s1 }
 0x30e   :  { %446 = vrot.lane.b32.xlu0 %v421_v31, %s608_s1  ;;  %v418_v32 = vsel %vm127_vm9, %v379_v29, %v385_v30 }
 0x30f   :  { %444 = vrot.lane.b32.xlu2 %v418_v32, %s608_s1 }
 0x313   :  { %v357_v1 = vpop.permute.xlu0 %356 }
 0x314   :  { %v369_v6 = vpop.permute.xlu1 %368 }
 0x315   :  { %v373_v34 = vsel %vm372_vm3, %v369_v6, %v371_v26 }
 0x316   :  { %v412_v35 = vsel %vm127_vm9, %v367_v33, %v373_v34 }
 0x317   :  { %440 = vrot.lane.b32.xlu0 %v412_v35, %s608_s1  ;;  %322 = vrot.lane.b32.xlu2 %v321_v10, %s600_s5 }
 0x31b   :  { %v335_v40 = vpop.permute.xlu0 %334 }
 0x31c   :  { %v359_v36 = vpop.permute.xlu1 %358  ;;  %v349_v54 = vsel %vm127_vm9, %v333_v41, %v335_v40 }
 0x31d   :  { %v361_v37 = vsel %vm360_vm4, %v357_v1, %v359_v36  ;;  %v409_v38 = vsel %vm127_vm9, %v761_v4, %v359_v36 }
 0x31e   :  { %438 = vrot.lane.b32.xlu1 %v409_v38, %s608_s1  ;;  %v406_v39 = vsel %vm127_vm9, %v763_v5, %v361_v37 }
 0x31f   :  { %436 = vrot.lane.b32.xlu0 %v406_v39, %s608_s1 }
 0x323   :  { %v329_v42 = vpop.permute.xlu0 %328 }
 0x324   :  { %v337_v46 = vpop.permute.xlu1 %336 }
 0x32c   :  { %v331_v51 = vpop.permute.xlu1 %330 }
 0x32d   :  { %v346_v59 = vsel %vm127_vm9, %v329_v42, %v331_v51 }
 0x334   :  { %v325_v52 = vpop.permute.xlu1 %324 }
 0x335   :  { %v343_v0 = vsel %vm127_vm9, %v325_v52, %v327_v43 }
 0x34e   :  { %v455_v44 = vpop.permute.xlu0 %454 }
 0x34f   :  { %v488_v45 = vsel %vm127_vm9, %v455_v44, 0 }
 0x350   :  { %v453_v7 = vpop.permute.xlu2 %452  ;;  %506 = vmatpush.bf16.msra.mxu3 %v488_v45 }
 0x351   :  { %v460_v47 = vsel %vm402_vm13, %v453_v7, %v455_v44 }
 0x352   :  { %v480_v48 = vsel %vm465_vm5, %v337_v46, %v460_v47 }
 0x353   :  { %v485_v49 = vsel %vm127_vm9, %v480_v48, 0 }
 0x354   :  { %493 = vmatpush.bf16.msra.mxu2 %v485_v49 }
 0x358   :  { %v451_v50 = vpop.permute.xlu2 %450 }
 0x359   :  { %507 = vmatpush.bf16.msra.mxu3 %v451_v50 }
 0x369   :  { %v445_v57 = vpop.permute.xlu2 %444 }
 0x371   :  { %v449_v53 = vpop.permute.xlu1 %448  ;;  %v323_v5 = vpop.permute.xlu2 %322 }
 0x372   :  { %v459_v55 = vsel %vm402_vm13, %v449_v53, %v451_v50  ;;  %v340_v12 = vsel %vm127_vm9, %v781_v8, %v323_v5  ;;  %vm523_vm9 = vcmask 392192  }
 0x373   :  { %v476_v56 = vsel %vm465_vm5, %v349_v54, %v459_v55 }
 0x374   :  { %494 = vmatpush.bf16.msra.mxu2 %v476_v56 }
 0x37f   :  { %v443_v62 = vpop.permute.xlu1 %442 }
 0x380   :  { %v447_v58 = vpop.permute.xlu0 %446 }
 0x381   :  { %v458_v60 = vsel %vm402_vm13, %v445_v57, %v447_v58  ;;  %508 = vmatpush.bf16.msra.mxu3 %v447_v58 }
 0x382   :  { %v473_v61 = vsel %vm465_vm5, %v346_v59, %v458_v60 }
 0x383   :  { %495 = vmatpush.bf16.msra.mxu2 %v473_v61 }
 0x385   :  { %509 = vmatpush.bf16.msra.mxu3 %v443_v62 }
 0x389   :  { %v441_v63 = vpop.permute.xlu0 %440 }
 0x38a   :  { %v457_v3 = vsel %vm402_vm13, %v441_v63, %v443_v62 }
 0x38b   :  { %v470_v4 = vsel %vm465_vm5, %v343_v0, %v457_v3 }
 0x38c   :  { %496 = vmatpush.bf16.msra.mxu2 %v470_v4 }
 0x390   :  { %v439_v9 = vpop.permute.xlu1 %438 }
 0x391   :  { %v437_v10 = vpop.permute.xlu0 %436  ;;  %510 = vmatpush.bf16.msra.mxu3 %v439_v9 }
 0x392   :  { %v456_v13 = vsel %vm402_vm13, %v437_v10, %v439_v9 }
 0x393   :  { %v467_v14 = vsel %vm465_vm5, %v340_v12, %v456_v13 }
 0x394   :  { %497 = vmatpush.bf16.msra.mxu2 %v467_v14  ;;  %556 = vmatmul.msk.bf16.vlgmr.msra.gmra.mxu3 %vm481_vm6, %v317_v11 }
 0x397   :  { %555 = vmatmul.msk.bf16.vlgmr.msra.gmra.mxu2 %vm481_vm6, %v317_v11 }
 0x417   :  { %v512_v15 = vpop.f32.mrf.mxu3 }
 0x418   :  { %521 = vrot.lane.b32.xlu0 %v512_v15, %s613_s19 }
 0x41a   :  { %v499_v16 = vpop.f32.mrf.mxu2 }
 0x41b   :  { %516 = vst.msk [vmem:[#allocation3] sm:$0xff] %vm465_vm5, %v499_v16  ;;  %519 = vrot.lane.b32.xlu2 %v499_v16, %s613_s19 }
 0x41f   :  { %v514_v17 = vpop.f32.mrf.mxu3 }
 0x422   :  { %v501_v18 = vpop.f32.mrf.mxu2 }
 0x475   :  { %v520_v8 = vpop.permute.xlu2 %519 }
 0x48a   :  { %v522_v20 = vpop.permute.xlu0 %521 }
 0x48b   :  { %v524_v21 = vsel %vm523_vm9, %v520_v8, %v522_v20 }
 0x48c   :  { %527 = vst.msk [vmem:[#allocation3 + $0x8] sm:$0xff] %vm465_vm5, %v524_v21 }
 0x48d   :  { %540 = dma.vmem_to_hbm [thread:$0]  %s533_s20, 256, %s535_s23, [#allocation4], %s615_s24, %s615_s24, %s616_s25  }
 0x48e   :  { %598 = dma.done.wait [#allocation4], 256  }
 0x48f   :  { %599 = vsyncadd [#allocation4], 4294967040 }
 0x490   :  { %545 = vsyncpa [#allocation4], 1 }

</bundles_post_ra>
